<compile_context>
chip_gen: v7x
topology: tpu7x:2x2x1
jax: 0.10.0
libtpu: 0.0.40
codegen_flags: <defaults>
</compile_context>

<pallas_src>
import functools

import jax
import jax.numpy as jnp
import numpy as np
from jax.experimental import pallas as pl
from jax.experimental.pallas import tpu as pltpu


def coupling_kernel(ws_ref, wt_ref, bs_ref, bt_ref,          # SMEM params
                    ldj_ref, z_ref, m_ref, im_ref, sm_ref,   # VMEM inputs
                    zout_ref, ldjout_ref,                    # VMEM outputs
                    *, c, hw, reverse=False):
    # Lane-dense per-channel views; offsets are static multiples of HW
    # (HW % 128 == 0 here), so these are whole-lane-tile slices.
    z_rows = [z_ref[:, ci * hw:(ci + 1) * hw] for ci in range(c)]      # (bt, hw)
    zin_rows = [z_rows[ci] * m_ref[:, ci * hw:(ci + 1) * hw]           # z * mask
                for ci in range(c)]                                    # (bt, hw)

    s_acc = None
    for co in range(c):
        # 1x1 conv producing channel `co` of (s, t): unrolled VPU FMAs with
        # scalar weights broadcast from SMEM.  The s-half of W / bias was
        # pre-scaled by 1/exp(scaling_factor) in the wrapper, so `u` is already
        # raw_s / s_fac.
        u = zin_rows[0] * ws_ref[0, co]
        v = zin_rows[0] * wt_ref[0, co]
        for ci in range(1, c):
            u = u + zin_rows[ci] * ws_ref[ci, co]
            v = v + zin_rows[ci] * wt_ref[ci, co]
        u = u + bs_ref[co]
        v = v + bt_ref[co]

        # s = tanh(raw_s / s_fac) * s_fac * (1 - mask)   (sm = s_fac*(1-mask))
        s = jnp.tanh(u) * sm_ref[:, co * hw:(co + 1) * hw]
        # t = raw_t * (1 - mask)
        t = v * im_ref[:, co * hw:(co + 1) * hw]

        if not reverse:
            zout_ref[:, co * hw:(co + 1) * hw] = (z_rows[co] + t) * jnp.exp(s)
        else:
            zout_ref[:, co * hw:(co + 1) * hw] = z_rows[co] * jnp.exp(-s) - t

        s_acc = s if s_acc is None else s_acc + s

    # Single cross-lane reduction for the log-det-Jacobian contribution.
    ldj_delta = jnp.sum(s_acc, axis=1, keepdims=True)
    if not reverse:
        ldjout_ref[...] = ldj_ref[...] + ldj_delta
    else:
        ldjout_ref[...] = ldj_ref[...] - ldj_delta


def _pick_batch_tile(n, row_bytes, budget_bytes=6 * 1024 * 1024):
    """Batch tile that (a) divides n, (b) is a multiple of 8 or equals n
    (8,128 block rule), (c) keeps one f32 z-block <= budget (safe on the
    64 MiB-VMEM v7x), and (d) prefers >= 2 grid steps (dual TensorCore)."""
    cands = [b for b in range(1, n + 1)
             if n % b == 0 and (b % 8 == 0 or b == n)]
    fit = [b for b in cands if b * row_bytes <= budget_bytes] or [min(cands)]
    multi = [b for b in fit if n // b >= 2]
    return max(multi) if multi else max(fit)


def coupling_forward(z_nchw, ldj, mask_nchw, W, bias, scaling_factor, reverse=False):
    """z_nchw: (N, C, H, W) f32; ldj: (N,) f32; mask_nchw: (1, C, H, W);
    W: (C, 2C) 1x1-conv weight; bias: (2C,); scaling_factor: (C,)."""
    N, C, H, Wd = z_nchw.shape
    HW = H * Wd
    CHW = C * HW

    # Free reshapes only; constant math hoisted out of the kernel.
    z_flat = z_nchw.reshape(N, CHW).astype(jnp.float32)
    mask_flat = mask_nchw.reshape(1, CHW).astype(jnp.float32)
    inv_mask = 1.0 - mask_flat
    sfac = jnp.exp(scaling_factor.astype(jnp.float32))                   # (C,)
    inv_sfac = 1.0 / sfac
    # Fold 1/s_fac into the s-half of the 1x1-conv weights/bias (one less mul/elem).
    Ws = (W[:, :C] * inv_sfac[None, :]).astype(jnp.float32)              # (C, C)
    Wt = W[:, C:].astype(jnp.float32)                                    # (C, C)
    b_s = (bias[:C] * inv_sfac).astype(jnp.float32)                      # (C,)
    b_t = bias[C:].astype(jnp.float32)                                   # (C,)
    # Fold s_fac * (1 - mask) into one per-channel spatial map (one less mul/elem).
    sm = (sfac[:, None] * inv_mask.reshape(C, HW)).reshape(1, CHW)

    ldj2 = ldj.reshape(N, 1).astype(jnp.float32)

    row_bytes = CHW * 4
    btile = _pick_batch_tile(N, row_bytes)
    grid = (N // btile,)

    # Real footprint: 2x double-buffered z in + 2x z out + ~1 block of zin
    # temporaries + 1 block working set + three resident (1, CHW) maps.
    block_bytes = btile * row_bytes
    vmem_limit = int(min(48 << 20,
                         max(16 << 20, 6 * block_bytes + 3 * CHW * 4 + (2 << 20))))

    z_out, ldj_out = pl.pallas_call(
        functools.partial(coupling_kernel, c=C, hw=HW, reverse=reverse),
        out_shape=(jax.ShapeDtypeStruct((N, CHW), jnp.float32),
                   jax.ShapeDtypeStruct((N, 1), jnp.float32)),
        grid=grid,
        in_specs=[
            pl.BlockSpec(memory_space=pltpu.SMEM),            # Ws (C, C)
            pl.BlockSpec(memory_space=pltpu.SMEM),            # Wt (C, C)
            pl.BlockSpec(memory_space=pltpu.SMEM),            # b_s (C,)
            pl.BlockSpec(memory_space=pltpu.SMEM),            # b_t (C,)
            pl.BlockSpec((btile, 1), lambda i: (i, 0)),       # ldj (per-block)
            pl.BlockSpec((btile, CHW), lambda i: (i, 0)),     # z (batch-tiled, lane-dense)
            pl.BlockSpec((1, CHW), lambda i: (0, 0)),         # mask (resident)
            pl.BlockSpec((1, CHW), lambda i: (0, 0)),         # 1 - mask (resident)
            pl.BlockSpec((1, CHW), lambda i: (0, 0)),         # s_fac * (1 - mask) (resident)
        ],
        out_specs=(
            pl.BlockSpec((btile, CHW), lambda i: (i, 0)),     # z out (lane-dense)
            pl.BlockSpec((btile, 1), lambda i: (i, 0)),       # ldj out (per-block -> megacore-safe)
        ),
        compiler_params=pltpu.CompilerParams(
            dimension_semantics=("parallel",),
            vmem_limit_bytes=vmem_limit,
        ),
    )(Ws, Wt, b_s, b_t, ldj2, z_flat, mask_flat, inv_mask, sm)

    return z_out.reshape(N, C, H, Wd), ldj_out.reshape(N)


def reference_forward(z, ldj, mask, W, bias, scaling_factor, reverse=False):
    """Pure-JAX mirror of the PyTorch module (NCHW), for verification."""
    z_in = z * mask
    nn_out = jnp.einsum('nchw,cd->ndhw', z_in, W) + bias[None, :, None, None]
    C = z.shape[1]
    s, t = nn_out[:, :C], nn_out[:, C:]
    s_fac = jnp.exp(scaling_factor).reshape(1, -1, 1, 1)
    s = jnp.tanh(s / s_fac) * s_fac
    s = s * (1 - mask)
    t = t * (1 - mask)
    if not reverse:
        z = (z + t) * jnp.exp(s)
        ldj = ldj + s.sum(axis=(1, 2, 3))
    else:
        z = z * jnp.exp(-s) - t
        ldj = ldj - s.sum(axis=(1, 2, 3))
    return z, ldj


def create_checkerboard_mask(h, w, c, invert=False):
    x = jnp.arange(h)
    y = jnp.arange(w)
    xx, yy = jnp.meshgrid(x, y, indexing='ij')
    mask = jnp.fmod(xx + yy, 2).astype(jnp.float32).reshape(1, 1, h, w)
    mask = jnp.broadcast_to(mask, (1, c, h, w))
    if invert:
        mask = 1.0 - mask
    return mask


if __name__ == "__main__":
    key = jax.random.PRNGKey(0)
    k1, k2, k3, k4, k5 = jax.random.split(key, 5)

    N, C, H, W_ = 2, 4, 16, 16
    z = jax.random.normal(k1, (N, C, H, W_), dtype=jnp.float32)
    ldj = 0.1 * jax.random.normal(k5, (N,), dtype=jnp.float32)
    mask = create_checkerboard_mask(H, W_, C)

    # Deterministic synthetic parameters (network = 1x1 conv producing 2*C channels).
    W_net = 0.1 * jax.random.normal(k2, (C, 2 * C), dtype=jnp.float32)
    b_net = 0.1 * jax.random.normal(k3, (2 * C,), dtype=jnp.float32)
    scaling_factor = 0.1 * jax.random.normal(k4, (C,), dtype=jnp.float32)

    # Forward
    z_out, ldj_out = coupling_forward(z, ldj, mask, W_net, b_net, scaling_factor,
                                      reverse=False)
    jax.block_until_ready((z_out, ldj_out))
    z_ref, ldj_ref = reference_forward(z, ldj, mask, W_net, b_net, scaling_factor,
                                       reverse=False)
    assert np.allclose(np.asarray(z_out), np.asarray(z_ref), rtol=1e-5, atol=1e-5)
    assert np.allclose(np.asarray(ldj_out), np.asarray(ldj_ref), rtol=1e-5, atol=1e-4)

    # Reverse
    zr_out, ldjr_out = coupling_forward(z, ldj, mask, W_net, b_net, scaling_factor,
                                        reverse=True)
    jax.block_until_ready((zr_out, ldjr_out))
    zr_ref, ldjr_ref = reference_forward(z, ldj, mask, W_net, b_net, scaling_factor,
                                         reverse=True)
    assert np.allclose(np.asarray(zr_out), np.asarray(zr_ref), rtol=1e-5, atol=1e-5)
    assert np.allclose(np.asarray(ldjr_out), np.asarray(ldjr_ref), rtol=1e-5, atol=1e-4)

    print("KERNEL_OK")
</pallas_src>

<mosaic_0001>
module attributes {stable_mosaic.version = 11 : i64} {
  func.func @coupling_kernel(%arg0: i32, %arg1: memref<4x4xf32, #tpu.memory_space<smem>>, %arg2: memref<4x4xf32, #tpu.memory_space<smem>>, %arg3: memref<4xf32, #tpu.memory_space<smem>>, %arg4: memref<4xf32, #tpu.memory_space<smem>>, %arg5: memref<2x1xf32, #tpu.memory_space<vmem>>, %arg6: memref<2x1024xf32, #tpu.memory_space<vmem>>, %arg7: memref<1x1024xf32, #tpu.memory_space<vmem>>, %arg8: memref<1x1024xf32, #tpu.memory_space<vmem>>, %arg9: memref<1x1024xf32, #tpu.memory_space<vmem>>, %arg10: memref<2x1024xf32, #tpu.memory_space<vmem>>, %arg11: memref<2x1xf32, #tpu.memory_space<vmem>>) attributes {dimension_semantics = [#tpu.dimension_semantics<parallel>], iteration_bounds = array<i64: 1>, scalar_prefetch = 0 : i64, scratch_operands = 0 : i64, tpu.core_type = #tpu.core_type<tc>, window_params = [{transform_indices = @transform_0, window_bounds = array<i64: 4, 4>}, {transform_indices = @transform_1, window_bounds = array<i64: 4, 4>}, {transform_indices = @transform_2, window_bounds = array<i64: 4>}, {transform_indices = @transform_3, window_bounds = array<i64: 4>}, {transform_indices = @transform_4, window_bounds = array<i64: 2, 1>}, {transform_indices = @transform_5, window_bounds = array<i64: 2, 1024>}, {pipeline_mode = #tpu.pipeline_mode<synchronous>, transform_indices = @transform_6, window_bounds = array<i64: 1, 1024>}, {pipeline_mode = #tpu.pipeline_mode<synchronous>, transform_indices = @transform_7, window_bounds = array<i64: 1, 1024>}, {pipeline_mode = #tpu.pipeline_mode<synchronous>, transform_indices = @transform_8, window_bounds = array<i64: 1, 1024>}, {transform_indices = @transform_9, window_bounds = array<i64: 2, 1024>}, {transform_indices = @transform_10, window_bounds = array<i64: 2, 1>}]} {
    %c0 = arith.constant 0 : index
    %c0_0 = arith.constant 0 : index
    %0 = vector.load %arg6[%c0, %c0_0] : memref<2x1024xf32, #tpu.memory_space<vmem>>, vector<2x256xf32>
    %c0_1 = arith.constant 0 : index
    %c256 = arith.constant 256 : index
    %1 = vector.load %arg6[%c0_1, %c256] : memref<2x1024xf32, #tpu.memory_space<vmem>>, vector<2x256xf32>
    %c0_2 = arith.constant 0 : index
    %c512 = arith.constant 512 : index
    %2 = vector.load %arg6[%c0_2, %c512] : memref<2x1024xf32, #tpu.memory_space<vmem>>, vector<2x256xf32>
    %c0_3 = arith.constant 0 : index
    %c768 = arith.constant 768 : index
    %3 = vector.load %arg6[%c0_3, %c768] : memref<2x1024xf32, #tpu.memory_space<vmem>>, vector<2x256xf32>
    %c0_4 = arith.constant 0 : index
    %c0_5 = arith.constant 0 : index
    %4 = vector.load %arg7[%c0_4, %c0_5] : memref<1x1024xf32, #tpu.memory_space<vmem>>, vector<1x256xf32>
    %5 = vector.broadcast %4 : vector<1x256xf32> to vector<2x256xf32>
    %6 = arith.mulf %0, %5 : vector<2x256xf32>
    %c0_6 = arith.constant 0 : index
    %c256_7 = arith.constant 256 : index
    %7 = vector.load %arg7[%c0_6, %c256_7] : memref<1x1024xf32, #tpu.memory_space<vmem>>, vector<1x256xf32>
    %8 = vector.broadcast %7 : vector<1x256xf32> to vector<2x256xf32>
    %9 = arith.mulf %1, %8 : vector<2x256xf32>
    %c0_8 = arith.constant 0 : index
    %c512_9 = arith.constant 512 : index
    %10 = vector.load %arg7[%c0_8, %c512_9] : memref<1x1024xf32, #tpu.memory_space<vmem>>, vector<1x256xf32>
    %11 = vector.broadcast %10 : vector<1x256xf32> to vector<2x256xf32>
    %12 = arith.mulf %2, %11 : vector<2x256xf32>
    %c0_10 = arith.constant 0 : index
    %c768_11 = arith.constant 768 : index
    %13 = vector.load %arg7[%c0_10, %c768_11] : memref<1x1024xf32, #tpu.memory_space<vmem>>, vector<1x256xf32>
    %14 = vector.broadcast %13 : vector<1x256xf32> to vector<2x256xf32>
    %15 = arith.mulf %3, %14 : vector<2x256xf32>
    %c0_12 = arith.constant 0 : index
    %c0_13 = arith.constant 0 : index
    %16 = memref.load %arg1[%c0_12, %c0_13] : memref<4x4xf32, #tpu.memory_space<smem>>
    %17 = vector.broadcast %16 : f32 to vector<2x256xf32>
    %18 = arith.mulf %6, %17 : vector<2x256xf32>
    %c0_14 = arith.constant 0 : index
    %c0_15 = arith.constant 0 : index
    %19 = memref.load %arg2[%c0_14, %c0_15] : memref<4x4xf32, #tpu.memory_space<smem>>
    %20 = vector.broadcast %19 : f32 to vector<2x256xf32>
    %21 = arith.mulf %6, %20 : vector<2x256xf32>
    %c1 = arith.constant 1 : index
    %c0_16 = arith.constant 0 : index
    %22 = memref.load %arg1[%c1, %c0_16] : memref<4x4xf32, #tpu.memory_space<smem>>
    %23 = vector.broadcast %22 : f32 to vector<2x256xf32>
    %24 = arith.mulf %9, %23 : vector<2x256xf32>
    %25 = arith.addf %18, %24 : vector<2x256xf32>
    %c1_17 = arith.constant 1 : index
    %c0_18 = arith.constant 0 : index
    %26 = memref.load %arg2[%c1_17, %c0_18] : memref<4x4xf32, #tpu.memory_space<smem>>
    %27 = vector.broadcast %26 : f32 to vector<2x256xf32>
    %28 = arith.mulf %9, %27 : vector<2x256xf32>
    %29 = arith.addf %21, %28 : vector<2x256xf32>
    %c2 = arith.constant 2 : index
    %c0_19 = arith.constant 0 : index
    %30 = memref.load %arg1[%c2, %c0_19] : memref<4x4xf32, #tpu.memory_space<smem>>
    %31 = vector.broadcast %30 : f32 to vector<2x256xf32>
    %32 = arith.mulf %12, %31 : vector<2x256xf32>
    %33 = arith.addf %25, %32 : vector<2x256xf32>
    %c2_20 = arith.constant 2 : index
    %c0_21 = arith.constant 0 : index
    %34 = memref.load %arg2[%c2_20, %c0_21] : memref<4x4xf32, #tpu.memory_space<smem>>
    %35 = vector.broadcast %34 : f32 to vector<2x256xf32>
    %36 = arith.mulf %12, %35 : vector<2x256xf32>
    %37 = arith.addf %29, %36 : vector<2x256xf32>
    %c3 = arith.constant 3 : index
    %c0_22 = arith.constant 0 : index
    %38 = memref.load %arg1[%c3, %c0_22] : memref<4x4xf32, #tpu.memory_space<smem>>
    %39 = vector.broadcast %38 : f32 to vector<2x256xf32>
    %40 = arith.mulf %15, %39 : vector<2x256xf32>
    %41 = arith.addf %33, %40 : vector<2x256xf32>
    %c3_23 = arith.constant 3 : index
    %c0_24 = arith.constant 0 : index
    %42 = memref.load %arg2[%c3_23, %c0_24] : memref<4x4xf32, #tpu.memory_space<smem>>
    %43 = vector.broadcast %42 : f32 to vector<2x256xf32>
    %44 = arith.mulf %15, %43 : vector<2x256xf32>
    %45 = arith.addf %37, %44 : vector<2x256xf32>
    %c0_25 = arith.constant 0 : index
    %46 = memref.load %arg3[%c0_25] : memref<4xf32, #tpu.memory_space<smem>>
    %47 = vector.broadcast %46 : f32 to vector<2x256xf32>
    %48 = arith.addf %41, %47 : vector<2x256xf32>
    %c0_26 = arith.constant 0 : index
    %49 = memref.load %arg4[%c0_26] : memref<4xf32, #tpu.memory_space<smem>>
    %50 = vector.broadcast %49 : f32 to vector<2x256xf32>
    %51 = arith.addf %45, %50 : vector<2x256xf32>
    %52 = math.tanh %48 : vector<2x256xf32>
    %c0_27 = arith.constant 0 : index
    %c0_28 = arith.constant 0 : index
    %53 = vector.load %arg9[%c0_27, %c0_28] : memref<1x1024xf32, #tpu.memory_space<vmem>>, vector<1x256xf32>
    %54 = vector.broadcast %53 : vector<1x256xf32> to vector<2x256xf32>
    %55 = arith.mulf %52, %54 : vector<2x256xf32>
    %c0_29 = arith.constant 0 : index
    %c0_30 = arith.constant 0 : index
    %56 = vector.load %arg8[%c0_29, %c0_30] : memref<1x1024xf32, #tpu.memory_space<vmem>>, vector<1x256xf32>
    %57 = vector.broadcast %56 : vector<1x256xf32> to vector<2x256xf32>
    %58 = arith.mulf %51, %57 : vector<2x256xf32>
    %59 = arith.addf %0, %58 : vector<2x256xf32>
    %60 = math.exp %55 : vector<2x256xf32>
    %61 = arith.mulf %59, %60 : vector<2x256xf32>
    %c0_31 = arith.constant 0 : index
    %c0_32 = arith.constant 0 : index
    %62 = vector.load %arg10[%c0_31, %c0_32] : memref<2x1024xf32, #tpu.memory_space<vmem>>, vector<2x256xf32>
    tpu.vector_store %arg10[%c0_31, %c0_32], %61 {strides = array<i32>} : memref<2x1024xf32, #tpu.memory_space<vmem>>, vector<2x256xf32>,
    %c0_33 = arith.constant 0 : index
    %c1_34 = arith.constant 1 : index
    %63 = memref.load %arg1[%c0_33, %c1_34] : memref<4x4xf32, #tpu.memory_space<smem>>
    %64 = vector.broadcast %63 : f32 to vector<2x256xf32>
    %65 = arith.mulf %6, %64 : vector<2x256xf32>
    %c0_35 = arith.constant 0 : index
    %c1_36 = arith.constant 1 : index
    %66 = memref.load %arg2[%c0_35, %c1_36] : memref<4x4xf32, #tpu.memory_space<smem>>
    %67 = vector.broadcast %66 : f32 to vector<2x256xf32>
    %68 = arith.mulf %6, %67 : vector<2x256xf32>
    %c1_37 = arith.constant 1 : index
    %c1_38 = arith.constant 1 : index
    %69 = memref.load %arg1[%c1_37, %c1_38] : memref<4x4xf32, #tpu.memory_space<smem>>
    %70 = vector.broadcast %69 : f32 to vector<2x256xf32>
    %71 = arith.mulf %9, %70 : vector<2x256xf32>
    %72 = arith.addf %65, %71 : vector<2x256xf32>
    %c1_39 = arith.constant 1 : index
    %c1_40 = arith.constant 1 : index
    %73 = memref.load %arg2[%c1_39, %c1_40] : memref<4x4xf32, #tpu.memory_space<smem>>
    %74 = vector.broadcast %73 : f32 to vector<2x256xf32>
    %75 = arith.mulf %9, %74 : vector<2x256xf32>
    %76 = arith.addf %68, %75 : vector<2x256xf32>
    %c2_41 = arith.constant 2 : index
    %c1_42 = arith.constant 1 : index
    %77 = memref.load %arg1[%c2_41, %c1_42] : memref<4x4xf32, #tpu.memory_space<smem>>
    %78 = vector.broadcast %77 : f32 to vector<2x256xf32>
    %79 = arith.mulf %12, %78 : vector<2x256xf32>
    %80 = arith.addf %72, %79 : vector<2x256xf32>
    %c2_43 = arith.constant 2 : index
    %c1_44 = arith.constant 1 : index
    %81 = memref.load %arg2[%c2_43, %c1_44] : memref<4x4xf32, #tpu.memory_space<smem>>
    %82 = vector.broadcast %81 : f32 to vector<2x256xf32>
    %83 = arith.mulf %12, %82 : vector<2x256xf32>
    %84 = arith.addf %76, %83 : vector<2x256xf32>
    %c3_45 = arith.constant 3 : index
    %c1_46 = arith.constant 1 : index
    %85 = memref.load %arg1[%c3_45, %c1_46] : memref<4x4xf32, #tpu.memory_space<smem>>
    %86 = vector.broadcast %85 : f32 to vector<2x256xf32>
    %87 = arith.mulf %15, %86 : vector<2x256xf32>
    %88 = arith.addf %80, %87 : vector<2x256xf32>
    %c3_47 = arith.constant 3 : index
    %c1_48 = arith.constant 1 : index
    %89 = memref.load %arg2[%c3_47, %c1_48] : memref<4x4xf32, #tpu.memory_space<smem>>
    %90 = vector.broadcast %89 : f32 to vector<2x256xf32>
    %91 = arith.mulf %15, %90 : vector<2x256xf32>
    %92 = arith.addf %84, %91 : vector<2x256xf32>
    %c1_49 = arith.constant 1 : index
    %93 = memref.load %arg3[%c1_49] : memref<4xf32, #tpu.memory_space<smem>>
    %94 = vector.broadcast %93 : f32 to vector<2x256xf32>
    %95 = arith.addf %88, %94 : vector<2x256xf32>
    %c1_50 = arith.constant 1 : index
    %96 = memref.load %arg4[%c1_50] : memref<4xf32, #tpu.memory_space<smem>>
    %97 = vector.broadcast %96 : f32 to vector<2x256xf32>
    %98 = arith.addf %92, %97 : vector<2x256xf32>
    %99 = math.tanh %95 : vector<2x256xf32>
    %c0_51 = arith.constant 0 : index
    %c256_52 = arith.constant 256 : index
    %100 = vector.load %arg9[%c0_51, %c256_52] : memref<1x1024xf32, #tpu.memory_space<vmem>>, vector<1x256xf32>
    %101 = vector.broadcast %100 : vector<1x256xf32> to vector<2x256xf32>
    %102 = arith.mulf %99, %101 : vector<2x256xf32>
    %c0_53 = arith.constant 0 : index
    %c256_54 = arith.constant 256 : index
    %103 = vector.load %arg8[%c0_53, %c256_54] : memref<1x1024xf32, #tpu.memory_space<vmem>>, vector<1x256xf32>
    %104 = vector.broadcast %103 : vector<1x256xf32> to vector<2x256xf32>
    %105 = arith.mulf %98, %104 : vector<2x256xf32>
    %106 = arith.addf %1, %105 : vector<2x256xf32>
    %107 = math.exp %102 : vector<2x256xf32>
    %108 = arith.mulf %106, %107 : vector<2x256xf32>
    %c0_55 = arith.constant 0 : index
    %c256_56 = arith.constant 256 : index
    %109 = vector.load %arg10[%c0_55, %c256_56] : memref<2x1024xf32, #tpu.memory_space<vmem>>, vector<2x256xf32>
    tpu.vector_store %arg10[%c0_55, %c256_56], %108 {strides = array<i32>} : memref<2x1024xf32, #tpu.memory_space<vmem>>, vector<2x256xf32>,
    %110 = arith.addf %55, %102 : vector<2x256xf32>
    %c0_57 = arith.constant 0 : index
    %c2_58 = arith.constant 2 : index
    %111 = memref.load %arg1[%c0_57, %c2_58] : memref<4x4xf32, #tpu.memory_space<smem>>
    %112 = vector.broadcast %111 : f32 to vector<2x256xf32>
    %113 = arith.mulf %6, %112 : vector<2x256xf32>
    %c0_59 = arith.constant 0 : index
    %c2_60 = arith.constant 2 : index
    %114 = memref.load %arg2[%c0_59, %c2_60] : memref<4x4xf32, #tpu.memory_space<smem>>
    %115 = vector.broadcast %114 : f32 to vector<2x256xf32>
    %116 = arith.mulf %6, %115 : vector<2x256xf32>
    %c1_61 = arith.constant 1 : index
    %c2_62 = arith.constant 2 : index
    %117 = memref.load %arg1[%c1_61, %c2_62] : memref<4x4xf32, #tpu.memory_space<smem>>
    %118 = vector.broadcast %117 : f32 to vector<2x256xf32>
    %119 = arith.mulf %9, %118 : vector<2x256xf32>
    %120 = arith.addf %113, %119 : vector<2x256xf32>
    %c1_63 = arith.constant 1 : index
    %c2_64 = arith.constant 2 : index
    %121 = memref.load %arg2[%c1_63, %c2_64] : memref<4x4xf32, #tpu.memory_space<smem>>
    %122 = vector.broadcast %121 : f32 to vector<2x256xf32>
    %123 = arith.mulf %9, %122 : vector<2x256xf32>
    %124 = arith.addf %116, %123 : vector<2x256xf32>
    %c2_65 = arith.constant 2 : index
    %c2_66 = arith.constant 2 : index
    %125 = memref.load %arg1[%c2_65, %c2_66] : memref<4x4xf32, #tpu.memory_space<smem>>
    %126 = vector.broadcast %125 : f32 to vector<2x256xf32>
    %127 = arith.mulf %12, %126 : vector<2x256xf32>
    %128 = arith.addf %120, %127 : vector<2x256xf32>
    %c2_67 = arith.constant 2 : index
    %c2_68 = arith.constant 2 : index
    %129 = memref.load %arg2[%c2_67, %c2_68] : memref<4x4xf32, #tpu.memory_space<smem>>
    %130 = vector.broadcast %129 : f32 to vector<2x256xf32>
    %131 = arith.mulf %12, %130 : vector<2x256xf32>
    %132 = arith.addf %124, %131 : vector<2x256xf32>
    %c3_69 = arith.constant 3 : index
    %c2_70 = arith.constant 2 : index
    %133 = memref.load %arg1[%c3_69, %c2_70] : memref<4x4xf32, #tpu.memory_space<smem>>
    %134 = vector.broadcast %133 : f32 to vector<2x256xf32>
    %135 = arith.mulf %15, %134 : vector<2x256xf32>
    %136 = arith.addf %128, %135 : vector<2x256xf32>
    %c3_71 = arith.constant 3 : index
    %c2_72 = arith.constant 2 : index
    %137 = memref.load %arg2[%c3_71, %c2_72] : memref<4x4xf32, #tpu.memory_space<smem>>
    %138 = vector.broadcast %137 : f32 to vector<2x256xf32>
    %139 = arith.mulf %15, %138 : vector<2x256xf32>
    %140 = arith.addf %132, %139 : vector<2x256xf32>
    %c2_73 = arith.constant 2 : index
    %141 = memref.load %arg3[%c2_73] : memref<4xf32, #tpu.memory_space<smem>>
    %142 = vector.broadcast %141 : f32 to vector<2x256xf32>
    %143 = arith.addf %136, %142 : vector<2x256xf32>
    %c2_74 = arith.constant 2 : index
    %144 = memref.load %arg4[%c2_74] : memref<4xf32, #tpu.memory_space<smem>>
    %145 = vector.broadcast %144 : f32 to vector<2x256xf32>
    %146 = arith.addf %140, %145 : vector<2x256xf32>
    %147 = math.tanh %143 : vector<2x256xf32>
    %c0_75 = arith.constant 0 : index
    %c512_76 = arith.constant 512 : index
    %148 = vector.load %arg9[%c0_75, %c512_76] : memref<1x1024xf32, #tpu.memory_space<vmem>>, vector<1x256xf32>
    %149 = vector.broadcast %148 : vector<1x256xf32> to vector<2x256xf32>
    %150 = arith.mulf %147, %149 : vector<2x256xf32>
    %c0_77 = arith.constant 0 : index
    %c512_78 = arith.constant 512 : index
    %151 = vector.load %arg8[%c0_77, %c512_78] : memref<1x1024xf32, #tpu.memory_space<vmem>>, vector<1x256xf32>
    %152 = vector.broadcast %151 : vector<1x256xf32> to vector<2x256xf32>
    %153 = arith.mulf %146, %152 : vector<2x256xf32>
    %154 = arith.addf %2, %153 : vector<2x256xf32>
    %155 = math.exp %150 : vector<2x256xf32>
    %156 = arith.mulf %154, %155 : vector<2x256xf32>
    %c0_79 = arith.constant 0 : index
    %c512_80 = arith.constant 512 : index
    %157 = vector.load %arg10[%c0_79, %c512_80] : memref<2x1024xf32, #tpu.memory_space<vmem>>, vector<2x256xf32>
    tpu.vector_store %arg10[%c0_79, %c512_80], %156 {strides = array<i32>} : memref<2x1024xf32, #tpu.memory_space<vmem>>, vector<2x256xf32>,
    %158 = arith.addf %110, %150 : vector<2x256xf32>
    %c0_81 = arith.constant 0 : index
    %c3_82 = arith.constant 3 : index
    %159 = memref.load %arg1[%c0_81, %c3_82] : memref<4x4xf32, #tpu.memory_space<smem>>
    %160 = vector.broadcast %159 : f32 to vector<2x256xf32>
    %161 = arith.mulf %6, %160 : vector<2x256xf32>
    %c0_83 = arith.constant 0 : index
    %c3_84 = arith.constant 3 : index
    %162 = memref.load %arg2[%c0_83, %c3_84] : memref<4x4xf32, #tpu.memory_space<smem>>
    %163 = vector.broadcast %162 : f32 to vector<2x256xf32>
    %164 = arith.mulf %6, %163 : vector<2x256xf32>
    %c1_85 = arith.constant 1 : index
    %c3_86 = arith.constant 3 : index
    %165 = memref.load %arg1[%c1_85, %c3_86] : memref<4x4xf32, #tpu.memory_space<smem>>
    %166 = vector.broadcast %165 : f32 to vector<2x256xf32>
    %167 = arith.mulf %9, %166 : vector<2x256xf32>
    %168 = arith.addf %161, %167 : vector<2x256xf32>
    %c1_87 = arith.constant 1 : index
    %c3_88 = arith.constant 3 : index
    %169 = memref.load %arg2[%c1_87, %c3_88] : memref<4x4xf32, #tpu.memory_space<smem>>
    %170 = vector.broadcast %169 : f32 to vector<2x256xf32>
    %171 = arith.mulf %9, %170 : vector<2x256xf32>
    %172 = arith.addf %164, %171 : vector<2x256xf32>
    %c2_89 = arith.constant 2 : index
    %c3_90 = arith.constant 3 : index
    %173 = memref.load %arg1[%c2_89, %c3_90] : memref<4x4xf32, #tpu.memory_space<smem>>
    %174 = vector.broadcast %173 : f32 to vector<2x256xf32>
    %175 = arith.mulf %12, %174 : vector<2x256xf32>
    %176 = arith.addf %168, %175 : vector<2x256xf32>
    %c2_91 = arith.constant 2 : index
    %c3_92 = arith.constant 3 : index
    %177 = memref.load %arg2[%c2_91, %c3_92] : memref<4x4xf32, #tpu.memory_space<smem>>
    %178 = vector.broadcast %177 : f32 to vector<2x256xf32>
    %179 = arith.mulf %12, %178 : vector<2x256xf32>
    %180 = arith.addf %172, %179 : vector<2x256xf32>
    %c3_93 = arith.constant 3 : index
    %c3_94 = arith.constant 3 : index
    %181 = memref.load %arg1[%c3_93, %c3_94] : memref<4x4xf32, #tpu.memory_space<smem>>
    %182 = vector.broadcast %181 : f32 to vector<2x256xf32>
    %183 = arith.mulf %15, %182 : vector<2x256xf32>
    %184 = arith.addf %176, %183 : vector<2x256xf32>
    %c3_95 = arith.constant 3 : index
    %c3_96 = arith.constant 3 : index
    %185 = memref.load %arg2[%c3_95, %c3_96] : memref<4x4xf32, #tpu.memory_space<smem>>
    %186 = vector.broadcast %185 : f32 to vector<2x256xf32>
    %187 = arith.mulf %15, %186 : vector<2x256xf32>
    %188 = arith.addf %180, %187 : vector<2x256xf32>
    %c3_97 = arith.constant 3 : index
    %189 = memref.load %arg3[%c3_97] : memref<4xf32, #tpu.memory_space<smem>>
    %190 = vector.broadcast %189 : f32 to vector<2x256xf32>
    %191 = arith.addf %184, %190 : vector<2x256xf32>
    %c3_98 = arith.constant 3 : index
    %192 = memref.load %arg4[%c3_98] : memref<4xf32, #tpu.memory_space<smem>>
    %193 = vector.broadcast %192 : f32 to vector<2x256xf32>
    %194 = arith.addf %188, %193 : vector<2x256xf32>
    %195 = math.tanh %191 : vector<2x256xf32>
    %c0_99 = arith.constant 0 : index
    %c768_100 = arith.constant 768 : index
    %196 = vector.load %arg9[%c0_99, %c768_100] : memref<1x1024xf32, #tpu.memory_space<vmem>>, vector<1x256xf32>
    %197 = vector.broadcast %196 : vector<1x256xf32> to vector<2x256xf32>
    %198 = arith.mulf %195, %197 : vector<2x256xf32>
    %c0_101 = arith.constant 0 : index
    %c768_102 = arith.constant 768 : index
    %199 = vector.load %arg8[%c0_101, %c768_102] : memref<1x1024xf32, #tpu.memory_space<vmem>>, vector<1x256xf32>
    %200 = vector.broadcast %199 : vector<1x256xf32> to vector<2x256xf32>
    %201 = arith.mulf %194, %200 : vector<2x256xf32>
    %202 = arith.addf %3, %201 : vector<2x256xf32>
    %203 = math.exp %198 : vector<2x256xf32>
    %204 = arith.mulf %202, %203 : vector<2x256xf32>
    %c0_103 = arith.constant 0 : index
    %c768_104 = arith.constant 768 : index
    %205 = vector.load %arg10[%c0_103, %c768_104] : memref<2x1024xf32, #tpu.memory_space<vmem>>, vector<2x256xf32>
    tpu.vector_store %arg10[%c0_103, %c768_104], %204 {strides = array<i32>} : memref<2x1024xf32, #tpu.memory_space<vmem>>, vector<2x256xf32>,
    %206 = arith.addf %158, %198 : vector<2x256xf32>
    %cst = arith.constant dense<0.000000e+00> : vector<2xf32>
    %207 = vector.multi_reduction <add>, %206, %cst [1] : vector<2x256xf32> to vector<2xf32>
    %208 = vector.shape_cast %207 : vector<2xf32> to vector<2x1xf32>
    %c0_105 = arith.constant 0 : index
    %c0_106 = arith.constant 0 : index
    %209 = vector.load %arg5[%c0_105, %c0_106] : memref<2x1xf32, #tpu.memory_space<vmem>>, vector<2x1xf32>
    %210 = arith.addf %209, %208 : vector<2x1xf32>
    %c0_107 = arith.constant 0 : index
    %c0_108 = arith.constant 0 : index
    %211 = vector.load %arg11[%c0_107, %c0_108] : memref<2x1xf32, #tpu.memory_space<vmem>>, vector<2x1xf32>
    tpu.vector_store %arg11[%c0_107, %c0_108], %210 {strides = array<i32>} : memref<2x1xf32, #tpu.memory_space<vmem>>, vector<2x1xf32>,
    return
  }
  func.func @transform_0(%arg0: i32) -> (i32, i32) {
    %c0_i32 = arith.constant 0 : i32
    %c0_i32_0 = arith.constant 0 : i32
    %c0_i32_1 = arith.constant 0 : i32
    return %c0_i32, %c0_i32_0 : i32, i32
  }
  func.func @transform_1(%arg0: i32) -> (i32, i32) {
    %c0_i32 = arith.constant 0 : i32
    %c0_i32_0 = arith.constant 0 : i32
    %c0_i32_1 = arith.constant 0 : i32
    return %c0_i32, %c0_i32_0 : i32, i32
  }
  func.func @transform_2(%arg0: i32) -> i32 {
    %c0_i32 = arith.constant 0 : i32
    %c0_i32_0 = arith.constant 0 : i32
    return %c0_i32 : i32
  }
  func.func @transform_3(%arg0: i32) -> i32 {
    %c0_i32 = arith.constant 0 : i32
    %c0_i32_0 = arith.constant 0 : i32
    return %c0_i32 : i32
  }
  func.func @transform_4(%arg0: i32) -> (i32, i32) {
    %c0_i32 = arith.constant 0 : i32
    %c0_i32_0 = arith.constant 0 : i32
    return %arg0, %c0_i32 : i32, i32
  }
  func.func @transform_5(%arg0: i32) -> (i32, i32) {
    %c0_i32 = arith.constant 0 : i32
    %c0_i32_0 = arith.constant 0 : i32
    return %arg0, %c0_i32 : i32, i32
  }
  func.func @transform_6(%arg0: i32) -> (i32, i32) {
    %c0_i32 = arith.constant 0 : i32
    %c0_i32_0 = arith.constant 0 : i32
    %c0_i32_1 = arith.constant 0 : i32
    return %c0_i32, %c0_i32_0 : i32, i32
  }
  func.func @transform_7(%arg0: i32) -> (i32, i32) {
    %c0_i32 = arith.constant 0 : i32
    %c0_i32_0 = arith.constant 0 : i32
    %c0_i32_1 = arith.constant 0 : i32
    return %c0_i32, %c0_i32_0 : i32, i32
  }
  func.func @transform_8(%arg0: i32) -> (i32, i32) {
    %c0_i32 = arith.constant 0 : i32
    %c0_i32_0 = arith.constant 0 : i32
    %c0_i32_1 = arith.constant 0 : i32
    return %c0_i32, %c0_i32_0 : i32, i32
  }
  func.func @transform_9(%arg0: i32) -> (i32, i32) {
    %c0_i32 = arith.constant 0 : i32
    %c0_i32_0 = arith.constant 0 : i32
    return %arg0, %c0_i32 : i32, i32
  }
  func.func @transform_10(%arg0: i32) -> (i32, i32) {
    %c0_i32 = arith.constant 0 : i32
    %c0_i32_0 = arith.constant 0 : i32
    return %arg0, %c0_i32 : i32, i32
  }
}

</mosaic_0001>

<bundles_post_ra>
// kernel: tpu_custom_call.1
= control target key start
LH: loop header
LB: loop body
LE: loop exit
PB: predicated region body
PF: predicated region fallthrough
CT: control target
= control target key end

     0   :  { %16 = vsyncpa [#allocation5], 0  ;;  %s1088_s0 = inlined_call_operand.hbm [shape: f32[4,4], index: 0, kind: input, shape index: {}]   ;;  %s1089_s1 = inlined_call_operand.hbm [shape: f32[4,4], index: 1, kind: input, shape index: {}]   ;;  %s1090_s2 = inlined_call_operand.vmem [shape: f32[4], index: 2, kind: input, shape index: {}]   ;;  %s1091_s3 = inlined_call_operand.vmem [shape: f32[4], index: 3, kind: input, shape index: {}]   ;;  %s1092_s4 = inlined_call_operand.vmem [shape: f32[2,1], index: 4, kind: input, shape index: {}]   ;;  %s1093_s5 = inlined_call_operand.vmem [shape: f32[2,1024], index: 5, kind: input, shape index: {}]   ;;  %s1094_s6 = inlined_call_operand.vmem [shape: f32[1,1024], index: 6, kind: input, shape index: {}]   ;;  %s1095_s7 = inlined_call_operand.hbm [shape: f32[1,1024], index: 7, kind: input, shape index: {}]   ;;  %s1096_s8 = inlined_call_operand.vmem [shape: f32[1,1024], index: 8, kind: input, shape index: {}]   ;;  %s1097_s9 = inlined_call_operand.hbm [shape: f32[2,1024], index: 9, kind: output, shape index: {0}]   ;;  %s1098_s10 = inlined_call_operand.vmem [shape: f32[2,1], index: 10, kind: output, shape index: {1}]  }
   0x1   :  { %17 = vsyncpa [#allocation8], 0 }
   0x2   :  { %18 = vsyncpa [#allocation6], 0 }
   0x3   :  { %19 = vsyncpa [#allocation11], 0 }
   0x4   :  { %20 = vsyncpa [#allocation3], 0 }
   0x5   :  { %21 = vsyncpa [#allocation4], 0  ;;  %s610_s15 = scalar_lea.hbm %s1088_s0, 64 }
   0x6   :  { %p611_p0 = scmp.ne.s32.totalorder %s1088_s0, %s610_s15  ;;  %p614_p1 = scmp.lt.u32.totalorder %s610_s15, %s1088_s0 }
   0x8   :  { %p616_p2 = pnand %p614_p1, %p611_p0 }
   0xa   :  { %619 = shalt.err (!%p616_p2)
}
   0xb   :  { %s710_s20 = smov [#allocation2]   ;;  %s620_s25 = scalar_lea.hbm %s1089_s1, 64 }
   0xc   :  { %29 = dma.hbm_to_smem %s1088_s0, 64, %s710_s20, [#allocation5]  }
   0xd   :  { %p621_p3 = scmp.ne.s32.totalorder %s1089_s1, %s620_s25  ;;  %p624_p4 = scmp.lt.u32.totalorder %s620_s25, %s1089_s1 }
   0xf   :  { %p626_p5 = pnand %p624_p4, %p621_p3 }
  0x11   :  { %629 = shalt.err (!%p626_p5)
}
  0x12   :  { %s711_s30 = smov [#allocation7]   ;;  %s44_s14 = sshll.u32 %s1090_s2, 4  ;;  %s45_s14 = int_to_ptr.vmem [resolvable:$true] %s44_s14 }
  0x13   :  { %37 = dma.hbm_to_smem %s1089_s1, 64, %s711_s30, [#allocation8]  }
  0x14   :  { %s54_s17 = sshll.u32 %s1091_s3, 4  ;;  %s630_s18 = scalar_lea.vmem %s45_s14, 16  ;;  %s55_s17 = int_to_ptr.vmem [resolvable:$true] %s54_s17 }
  0x15   :  { %p631_p6 = scmp.ne.s32.totalorder %s45_s14, %s630_s18  ;;  %p635_p7 = scmp.lt.s32.totalorder %s45_s14, %s45_s14 }
  0x16   :  { %p636_p8 = scmp.lt.s32.totalorder %s630_s18, %s630_s18 }
  0x18   :  { %p637_p9 = por %p636_p8, %p635_p7 }
  0x1a   :  { %p638_p10 = pnand %p637_p9, %p631_p6 }
  0x1c   :  { %641 = shalt.err (!%p638_p10)
}
  0x1d   :  { %s712_s19 = smov [#allocation9]   ;;  %s642_s1 = scalar_lea.vmem %s55_s17, 16 }
  0x1e   :  { %47 = dma.vmem_to_smem %s45_s14, 16, %s712_s19, [#allocation6]  }
  0x1f   :  { %p643_p11 = scmp.ne.s32.totalorder %s55_s17, %s642_s1  ;;  %p647_p12 = scmp.lt.s32.totalorder %s55_s17, %s55_s17 }
  0x20   :  { %p648_p13 = scmp.lt.s32.totalorder %s642_s1, %s642_s1 }
  0x22   :  { %p649_p0 = por %p648_p13, %p647_p12 }
  0x24   :  { %p650_p1 = pnand %p649_p0, %p643_p11 }
  0x26   :  { %653 = shalt.err (!%p650_p1)
}
  0x27   :  { %s713_s2 = smov [#allocation10]   ;;  %s714_s3 = smov [#allocation12]  }
  0x28   :  { %57 = dma.vmem_to_smem %s55_s17, 16, %s713_s2, [#allocation11]  }
  0x29   :  { %s70_s20 = sshll.u32 %s714_s3, 4  ;;  %s654_s23 = scalar_lea.hbm %s1095_s7, 128  ;;  %s71_s20 = int_to_ptr.vmem [resolvable:$true] %s70_s20 }
  0x2a   :  { %p655_p2 = scmp.ne.s32.totalorder %s1095_s7, %s654_s23  ;;  %p658_p3 = scmp.lt.u32.totalorder %s654_s23, %s1095_s7 }
  0x2c   :  { %p660_p4 = pnand %p658_p3, %p655_p2 }
  0x2e   :  { %663 = shalt.err (!%p660_p4)
}
  0x2f   :  { %s664_s28 = scalar_lea.vmem %s71_s20, 128  ;;  %p669_p6 = scmp.lt.s32.totalorder %s71_s20, %s71_s20 }
  0x30   :  { %p665_p5 = scmp.ne.s32.totalorder %s71_s20, %s664_s28  ;;  %p670_p7 = scmp.lt.s32.totalorder %s664_s28, %s664_s28 }
  0x32   :  { %p671_p8 = por %p670_p7, %p669_p6 }
  0x34   :  { %p672_p9 = pnand %p671_p8, %p665_p5 }
  0x36   :  { %675 = shalt.err (!%p672_p9)
}
  0x37   :  { %73 = dma.hbm_to_vmem [thread:$0]  %s1095_s7, 128, %s71_s20, [#allocation3]  }
  0x38   :  { %698 = dma.done.wait [#allocation5], 64  }
  0x39   :  { %699 = vsyncadd [#allocation5], 4294967232 }
  0x3a   :  { %700 = dma.done.wait [#allocation8], 64  }
  0x3b   :  { %701 = vsyncadd [#allocation8], 4294967232 }
  0x3c   :  { %702 = dma.done.wait [#allocation6], 16  }
  0x3d   :  { %703 = vsyncadd [#allocation6], 4294967280 }
  0x3e   :  { %704 = dma.done.wait [#allocation11], 16  }
  0x3f   :  { %705 = vsyncadd [#allocation11], 4294967280 }
  0x40   :  { %706 = dma.done.wait [#allocation3], 128  }
  0x41   :  { %707 = vsyncadd [#allocation3], 4294967168 }
  0x42   :  { %91 = sfence }
  0x43   :  { %v98_v0 = vlaneseq  ;;  %v96_v1 = vld [vmem:[%s1094_s6] sm:$0x3]  ;;  %v715_v3 = vmov 1983009808   ;;  %v116_v5 = vld [vmem:[%s1094_s6 + $0x2] sm:$0x3] }
  0x44   :  { %v108_v4 = vunpack.c.l.s4 %v715_v3  ;;  %v136_v6 = vld [vmem:[%s1094_s6 + $0x4] sm:$0x3]  ;;  %s823_s15 = sld [smem:[#allocation2]]  ;;  %v156_v10 = vld [vmem:[%s1094_s6 + $0x6] sm:$0x3]  ;;  %s862_s23 = sld [smem:[#allocation2 + $0x1]] }
  0x45   :  { %v99_v2 = vshrl.u32 %v98_v0, 7  ;;  %s832_s18 = sld [smem:[#allocation2 + $0x80]]  ;;  %v855_v21 = vld [vmem:[%s1093_s5] sm:$0xf]  ;;  %v860_v22 = vld [vmem:[%s1093_s5 + $0x4] sm:$0xf] }
  0x46   :  { %v109_v9 = vunpack.c.0.s8 %v108_v4  ;;  %s834_s19 = sld [smem:[#allocation2 + $0x100]]  ;;  %v867_v25 = vld [vmem:[%s1093_s5 + $0x8] sm:$0xf]  ;;  %s872_s27 = sld [smem:[#allocation2 + $0x81]]  ;;  %v877_v28 = vld [vmem:[%s1093_s5 + $0xc] sm:$0xf] }
  0x47   :  { %v825_v7 = vsub.s32 0, %v99_v2  ;;  %v827_v8 = vsub.s32 1, %v99_v2  ;;  %s841_s1 = sld [smem:[#allocation2 + $0x180]]  ;;  %s884_s11 = sld [smem:[#allocation7 + $0x1]]  ;;  %v213_v45 = vld [vmem:[%s1096_s8] sm:$0x3] }
  0x48   :  { %v838_v13 = vsub.s32 %v109_v9, %v99_v2  ;;  %s847_s6 = sld [smem:[#allocation7]]  ;;  %s892_s5 = sld [smem:[#allocation7 + $0x81]]  ;;  %vm518_vm0 = vcmask 1041408  }
  0x49   :  { %v101_v11 = vrot.slane %v96_v1, %v825_v7  ;;  %v105_v12 = vrot.slane %v96_v1, %v827_v8  ;;  %v121_v14 = vrot.slane %v116_v5, %v825_v7  ;;  %v125_v15 = vrot.slane %v116_v5, %v827_v8  ;;  %s849_s2 = sld [smem:[#allocation7 + $0x80]]  ;;  %s894_s12 = sld [smem:[#allocation2 + $0x101]] }
  0x4a   :  { %v141_v16 = vrot.slane %v136_v6, %v825_v7  ;;  %v145_v17 = vrot.slane %v136_v6, %v827_v8  ;;  %v161_v18 = vrot.slane %v156_v10, %v825_v7  ;;  %v165_v20 = vrot.slane %v156_v10, %v827_v8  ;;  %s870_s26 = sld [smem:[#allocation7 + $0x100]]  ;;  %s909_s0 = sld [smem:[#allocation2 + $0x181]]  ;;  %v233_v6 = vld [vmem:[#allocation12] sm:$0x3] }
  0x4b   :  { %v106_v19 = vcombine.low %v101_v11, %v105_v12  ;;  %v126_v23 = vcombine.low %v121_v14, %v125_v15  ;;  %v177_v31 = vstv %s823_s15  ;;  %s882_s30 = sld [smem:[#allocation9]]  ;;  %v183_v34 = vstv %s832_s18  ;;  %s918_s15 = sld [smem:[#allocation7 + $0x101]] }
  0x4c   :  { %v146_v24 = vcombine.low %v141_v16, %v145_v17  ;;  %v166_v27 = vcombine.low %v161_v18, %v165_v20  ;;  %v191_v35 = vstv %s834_s19  ;;  %s902_s7 = sld [smem:[#allocation7 + $0x180]]  ;;  %v259_v48 = vstv %s862_s23  ;;  %s922_s16 = sld [smem:[#allocation9 + $0x1]] }
  0x4d   :  { %v113_v26 = vrot.slane %v106_v19, %v838_v13  ;;  %v133_v29 = vrot.slane %v126_v23, %v838_v13  ;;  %v199_v40 = vstv %s841_s1  ;;  %v265_v52 = vstv %s872_s27  ;;  %s931_s17 = sld [smem:[#allocation2 + $0x2]]  ;;  %s933_s18 = sld [smem:[#allocation10]] }
  0x4e   :  { %v153_v30 = vrot.slane %v146_v24, %v838_v13  ;;  %v173_v33 = vrot.slane %v166_v27, %v838_v13  ;;  %v180_v41 = vstv %s847_s6  ;;  %v218_v56 = vrot.slane %v213_v45, %v825_v7  ;;  %s939_s19 = sld [smem:[#allocation7 + $0x181]]  ;;  %s944_s1 = sld [smem:[#allocation2 + $0x82]]  ;;  %v295_v24 = vld [vmem:[%s1096_s8 + $0x2] sm:$0x3] }
  0x4f   :  { %v887_v32 = vmul.f32 %v113_v26, %v855_v21  ;;  %v897_v36 = vmul.f32 %v133_v29, %v860_v22  ;;  %v187_v43 = vstv %s849_s2  ;;  %v262_v57 = vstv %s884_s11  ;;  %s951_s6 = sld [smem:[#allocation2 + $0x102]]  ;;  %s960_s3 = sld [smem:[#allocation10 + $0x1]] }
  0x50   :  { %v900_v37 = vmul.f32 %v153_v30, %v867_v25  ;;  %v905_v38 = vmul.f32 %v173_v33, %v877_v28  ;;  %v195_v54 = vstv %s870_s26  ;;  %v269_v59 = vstv %s892_s5  ;;  %s953_s2 = sld [smem:[#allocation2 + $0x182]]  ;;  %s980_s25 = sld [smem:[#allocation2 + $0x3]] }
  0x51   :  { %v178_v39 = vmul.f32 %v177_v31, %v887_v32  ;;  %v184_v42 = vmul.f32 %v183_v34, %v897_v36  ;;  %v181_v49 = vmul.f32 %v180_v41, %v887_v32  ;;  %v188_v50 = vmul.f32 %v187_v43, %v897_v36  ;;  %s965_s22 = sld [smem:[#allocation7 + $0x2]]  ;;  %v315_v41 = vld [vmem:[#allocation12 + $0x2] sm:$0x3]  ;;  %s982_s26 = sld [smem:[#allocation2 + $0x83]] }
  0x52   :  { %v192_v44 = vmul.f32 %v191_v35, %v900_v37  ;;  %v200_v47 = vmul.f32 %v199_v40, %v905_v38  ;;  %v260_v51 = vmul.f32 %v259_v48, %v887_v32  ;;  %v207_v55 = vstv %s882_s30  ;;  %s969_s23 = sld [smem:[#allocation7 + $0x82]]  ;;  %s993_s28 = sld [smem:[#allocation2 + $0x103]] }
  0x53   :  { %v185_v46 = vadd.f32 %v184_v42, %v178_v39  ;;  %v266_v58 = vmul.f32 %v265_v52, %v897_v36  ;;  %v273_v60 = vstv %s894_s12  ;;  %v203_v62 = vstv %s902_s7  ;;  %s971_s24 = sld [smem:[#allocation9 + $0x2]]  ;;  %s998_s29 = sld [smem:[#allocation2 + $0x183]] }
  0x54   :  { %v222_v63 = vrot.slane %v213_v45, %v827_v8  ;;  %v274_v0 = vmul.f32 %v273_v60, %v900_v37  ;;  %v189_v1 = vadd.f32 %v188_v50, %v181_v49  ;;  %v196_v2 = vmul.f32 %v195_v54, %v900_v37  ;;  %s985_s27 = sld [smem:[#allocation7 + $0x102]]  ;;  %s1010_s12 = sld [smem:[#allocation7 + $0x3]] }
  0x55   :  { %v193_v53 = vadd.f32 %v192_v44, %v185_v46  ;;  %v267_v3 = vadd.f32 %v266_v58, %v260_v51  ;;  %v281_v4 = vstv %s909_s0  ;;  %v263_v9 = vmul.f32 %v262_v57, %v887_v32  ;;  %s1002_s30 = sld [smem:[#allocation7 + $0x182]]  ;;  %s1012_s7 = sld [smem:[#allocation7 + $0x83]] }
  0x56   :  { %v270_v10 = vmul.f32 %v269_v59, %v897_v36  ;;  %v282_v11 = vmul.f32 %v281_v4, %v905_v38  ;;  %v277_v14 = vstv %s918_s15  ;;  %v204_v15 = vmul.f32 %v203_v62, %v905_v38  ;;  %v378_v4 = vld [vmem:[%s1096_s8 + $0x4] sm:$0x3]  ;;  %s1018_s0 = sld [smem:[#allocation9 + $0x3]]  ;;  %s1031_s14 = sld [smem:[#allocation10 + $0x2]] }
  0x57   :  { %v201_v61 = vadd.f32 %v200_v47, %v193_v53  ;;  %v275_v12 = vadd.f32 %v274_v0, %v267_v3  ;;  %v223_v16 = vcombine.low %v218_v56, %v222_v63  ;;  %v289_v17 = vstv %s922_s16  ;;  %s1028_s13 = sld [smem:[#allocation7 + $0x103]] }
  0x58   :  { %v197_v18 = vadd.f32 %v196_v2, %v189_v1  ;;  %v238_v19 = vrot.slane %v233_v6, %v825_v7  ;;  %v242_v20 = vrot.slane %v233_v6, %v827_v8  ;;  %v271_v26 = vadd.f32 %v270_v10, %v263_v9  ;;  %s1040_s15 = sld [smem:[#allocation7 + $0x183]] }
  0x59   :  { %v208_v5 = vadd.f32 %v207_v55, %v201_v61  ;;  %v283_v23 = vadd.f32 %v282_v11, %v275_v12  ;;  %v278_v27 = vmul.f32 %v277_v14, %v900_v37  ;;  %v342_v29 = vstv %s931_s17 }
  0x5a   :  { %v210_v30 = vstv %s933_s18  ;;  %v285_v31 = vstv %s939_s19  ;;  %v343_v34 = vmul.f32 %v342_v29, %v887_v32  ;;  %v230_v35 = vrot.slane %v223_v16, %v838_v13  ;;  %s716_s18 = smov [#allocation13]  }
  0x5b   :  { %594 = vtanh.f32 %v208_v5  ;;  %v290_v33 = vadd.f32 %v289_v17, %v283_v23  ;;  %v300_v39 = vrot.slane %v295_v24, %v825_v7  ;;  %v304_v40 = vrot.slane %v295_v24, %v827_v8  ;;  %s534_s19 = sshll.u32 %s716_s18, 4  ;;  %s535_s19 = int_to_ptr.vmem [resolvable:$true] %s534_s19 }
  0x5c   :  { %v348_v42 = vstv %s944_s1  ;;  %v205_v43 = vadd.f32 %v204_v15, %v197_v18  ;;  %v243_v44 = vcombine.low %v238_v19, %v242_v20  ;;  %v279_v46 = vadd.f32 %v278_v27, %v271_v26  ;;  %s676_s1 = scalar_lea.vmem %s535_s19, 256  ;;  %p681_p11 = scmp.lt.s32.totalorder %s535_s19, %s535_s19 }
  0x5d   :  { %596 = vtanh.f32 %v290_v33  ;;  %v349_v45 = vmul.f32 %v348_v42, %v897_v36  ;;  %v286_v47 = vmul.f32 %v285_v31, %v905_v38  ;;  %v356_v48 = vstv %s951_s6  ;;  %v398_v42 = vld [vmem:[#allocation12 + $0x4] sm:$0x3]  ;;  %p677_p10 = scmp.ne.s32.totalorder %s535_s19, %s676_s1  ;;  %p682_p12 = scmp.lt.s32.totalorder %s676_s1, %s676_s1 }
  0x5e   :  { %v364_v49 = vstv %s953_s2  ;;  %v320_v50 = vrot.slane %v315_v41, %v825_v7  ;;  %v324_v51 = vrot.slane %v315_v41, %v827_v8  ;;  %v357_v53 = vmul.f32 %v356_v48, %v900_v37 }
  0x5f   :  { %v350_v52 = vadd.f32 %v349_v45, %v343_v34  ;;  %v305_v54 = vcombine.low %v300_v39, %v304_v40  ;;  %v365_v55 = vmul.f32 %v364_v49, %v905_v38  ;;  %v250_v56 = vrot.slane %v243_v44, %v838_v13  ;;  %p683_p13 = por %p682_p12, %p681_p11 }
  0x60   :  { %v345_v57 = vstv %s965_s22  ;;  %v211_v60 = vadd.f32 %v210_v30, %v205_v43  ;;  %v292_v61 = vstv %s960_s3  ;;  %v352_v62 = vstv %s969_s23 }
  0x61   :  { %v358_v58 = vadd.f32 %v357_v53, %v350_v52  ;;  %v372_v63 = vstv %s971_s24  ;;  %v287_v1 = vadd.f32 %v286_v47, %v279_v46  ;;  %v325_v2 = vcombine.low %v320_v50, %v324_v51  ;;  %v461_v52 = vld [vmem:[%s1096_s8 + $0x6] sm:$0x3]  ;;  %s586_s8 = sld [smem:[#allocation10 + $0x3]]  ;;  %p684_p0 = pnand %p683_p13, %p677_p10 }
  0x62   :  { %v312_v5 = vrot.slane %v305_v54, %v838_v13  ;;  %v346_v6 = vmul.f32 %v345_v57, %v887_v32  ;;  %v425_v9 = vstv %s980_s25  ;;  %v431_v10 = vstv %s982_s26 }
  0x63   :  { %v366_v3 = vadd.f32 %v365_v55, %v358_v58  ;;  %v353_v12 = vmul.f32 %v352_v62, %v897_v36  ;;  %v360_v14 = vstv %s985_s27  ;;  %v383_v16 = vrot.slane %v378_v4, %v825_v7 }
  0x64   :  { %v387_v17 = vrot.slane %v378_v4, %v827_v8  ;;  %v426_v18 = vmul.f32 %v425_v9, %v887_v32  ;;  %v432_v19 = vmul.f32 %v431_v10, %v897_v36  ;;  %v252_v23 = vmul.f32 %v250_v56, %v211_v60 }
  0x65   :  { %v595_v59 = vpop.eup %594  ;;  %v373_v15 = vadd.f32 %v372_v63, %v366_v3  ;;  %v439_v24 = vstv %s993_s28  ;;  %v293_v26 = vadd.f32 %v292_v61, %v287_v1  ;;  %v354_v30 = vadd.f32 %v353_v12, %v346_v6 }
  0x66   :  { %v1005_v0 = vmul.f32 %v595_v59, %v230_v35  ;;  %v433_v29 = vadd.f32 %v432_v19, %v426_v18  ;;  %v361_v31 = vmul.f32 %v360_v14, %v900_v37  ;;  %v440_v33 = vmul.f32 %v439_v24, %v900_v37 }
  0x67   :  { %v597_v20 = vpop.eup %596  ;;  %v447_v34 = vstv %s998_s29  ;;  %v332_v35 = vrot.slane %v325_v2, %v838_v13  ;;  %v368_v40 = vstv %s1002_s30  ;;  %v388_v41 = vcombine.low %v383_v16, %v387_v17 }
  0x68   :  { %v254_v11 = vmul.f32 1.442695, %v1005_v0  ;;  %v314_v27 = vmul.f32 %v597_v20, %v312_v5  ;;  %v428_v43 = vstv %s1010_s12  ;;  %v435_v44 = vstv %s1012_s7 }
  0x69   :  { %v441_v45 = vadd.f32 %v440_v33, %v433_v29  ;;  %v448_v46 = vmul.f32 %v447_v34, %v905_v38  ;;  %v455_v47 = vstv %s1018_s0  ;;  %v253_v48 = vadd.f32 %v252_v23, %v855_v21 }
  0x6a   :  { %598 = vpow2.f32 %v254_v11  ;;  %v336_v39 = vmul.f32 1.442695, %v314_v27  ;;  %v362_v49 = vadd.f32 %v361_v31, %v354_v30  ;;  %v369_v50 = vmul.f32 %v368_v40, %v905_v38  ;;  %v481_v11 = vld [vmem:[#allocation12 + $0x6] sm:$0x3] }
  0x6b   :  { %600 = vtanh.f32 %v373_v15  ;;  %v449_v51 = vadd.f32 %v448_v46, %v441_v45  ;;  %v403_v53 = vrot.slane %v398_v42, %v825_v7  ;;  %v407_v54 = vrot.slane %v398_v42, %v827_v8 }
  0x6c   :  { %602 = vpow2.f32 %v336_v39  ;;  %v429_v55 = vmul.f32 %v428_v43, %v887_v32  ;;  %v436_v56 = vmul.f32 %v435_v44, %v897_v36  ;;  %v334_v57 = vmul.f32 %v332_v35, %v293_v26 }
  0x6d   :  { %v395_v21 = vrot.slane %v388_v41, %v838_v13  ;;  %v443_v58 = vstv %s1028_s13  ;;  %v456_v59 = vadd.f32 %v455_v47, %v449_v51  ;;  %v466_v60 = vrot.slane %v461_v52, %v825_v7 }
  0x6e   :  { %v470_v61 = vrot.slane %v461_v52, %v827_v8  ;;  %v370_v63 = vadd.f32 %v369_v50, %v362_v49  ;;  %v375_v1 = vstv %s1031_s14  ;;  %v408_v4 = vcombine.low %v403_v53, %v407_v54 }
  0x6f   :  { %604 = vtanh.f32 %v456_v59  ;;  %v437_v32 = vadd.f32 %v436_v56, %v429_v55  ;;  %v444_v36 = vmul.f32 %v443_v58, %v900_v37  ;;  %v335_v5 = vadd.f32 %v334_v57, %v860_v22 }
  0x70   :  { %v451_v9 = vstv %s1040_s15  ;;  %v471_v10 = vcombine.low %v466_v60, %v470_v61  ;;  %v376_v12 = vadd.f32 %v375_v1, %v370_v63  ;;  %v340_v16 = vadd.f32 %v314_v27, %v1005_v0 }
  0x71   :  { %v415_v17 = vrot.slane %v408_v4, %v838_v13  ;;  %v445_v18 = vadd.f32 %v444_v36, %v437_v32  ;;  %v452_v19 = vmul.f32 %v451_v9, %v905_v38  ;;  %v486_v22 = vrot.slane %v481_v11, %v825_v7 }
  0x72   :  { %v490_v37 = vrot.slane %v481_v11, %v827_v8  ;;  %v478_v23 = vrot.slane %v471_v10, %v838_v13  ;;  %v458_v0 = vstv %s586_s8 }
  0x73   :  { %v417_v24 = vmul.f32 %v415_v17, %v376_v12  ;;  %v453_v30 = vadd.f32 %v452_v19, %v445_v18 }
  0x74   :  { %v599_v62 = vpop.eup %598  ;;  %v491_v31 = vcombine.low %v486_v22, %v490_v37 }
  0x75   :  { %v601_v2 = vpop.eup %600  ;;  %v256_v3 = vmul.f32 %v599_v62, %v253_v48  ;;  %v418_v33 = vadd.f32 %v417_v24, %v867_v25  ;;  %v459_v35 = vadd.f32 %v458_v0, %v453_v30 }
  0x76   :  { %v397_v6 = vmul.f32 %v601_v2, %v395_v21  ;;  %v603_v15 = vpop.eup %602  ;;  %v498_v39 = vrot.slane %v491_v31, %v838_v13 }
  0x77   :  { %257 = vst [vmem:[#allocation13] sm:$0xf] %v256_v3  ;;  %v338_v20 = vmul.f32 %v603_v15, %v335_v5 }
  0x78   :  { %v419_v14 = vmul.f32 1.442695, %v397_v6  ;;  %v423_v26 = vadd.f32 %v397_v6, %v340_v16  ;;  %v500_v43 = vmul.f32 %v498_v39, %v459_v35 }
  0x79   :  { %339 = vst [vmem:[#allocation13 + $0x4] sm:$0xf] %v338_v20  ;;  %v605_v29 = vpop.eup %604 }
  0x7a   :  { %606 = vpow2.f32 %v419_v14  ;;  %v480_v27 = vmul.f32 %v605_v29, %v478_v23  ;;  %v501_v46 = vadd.f32 %v500_v43, %v877_v28 }
  0x7c   :  { %v502_v34 = vmul.f32 1.442695, %v480_v27  ;;  %v506_v38 = vadd.f32 %v480_v27, %v423_v26 }
  0x7e   :  { %608 = vpow2.f32 %v502_v34  ;;  %v514_v7 = vrot.slane %v506_v38, %v838_v13 }
  0x80   :  { %v515_v41 = vcombine.high %v514_v7, %v514_v7  ;;  %v519_v42 = vsel %vm518_vm0, %v514_v7, 0.0 }
  0x82   :  { %v520_v44 = vsel %vm518_vm0, %v515_v41, 0.0 }
  0x83   :  { %v521_v45 = vadd.f32 %v520_v44, %v519_v42 }
  0x84   :  { %v607_v8 = vpop.eup %606 }
  0x85   :  { %v421_v40 = vmul.f32 %v607_v8, %v418_v33  ;;  %522 = vadd.xlane.f32.xlu0 %v521_v45 }
  0x87   :  { %422 = vst [vmem:[#allocation13 + $0x8] sm:$0xf] %v421_v40 }
  0x88   :  { %v609_v25 = vpop.eup %608 }
  0x89   :  { %v504_v47 = vmul.f32 %v609_v25, %v501_v46 }
  0x8b   :  { %505 = vst [vmem:[#allocation13 + $0xc] sm:$0xf] %v504_v47 }
  0x8c   :  { %687 = shalt.err (!%p684_p0)
}
  0x8d   :  { %s688_s3 = scalar_lea.hbm %s1097_s9, 256 }
  0x8e   :  { %p689_p1 = scmp.ne.s32.totalorder %s1097_s9, %s688_s3  ;;  %p692_p2 = scmp.lt.u32.totalorder %s688_s3, %s1097_s9 }
  0x90   :  { %p694_p3 = pnand %p692_p2, %p689_p1 }
  0x92   :  { %697 = shalt.err (!%p694_p3)
}
  0x93   :  { %537 = dma.vmem_to_hbm [thread:$0]  %s535_s19, 256, %s1097_s9, [#allocation4]   ;;  %v524_v13 = vld [vmem:[%s1092_s4] sm:$0x3]  ;;  %vm526_vm1 = vcmask 1024  }
 0x112   :  { %v523_v28 = vpop.xlane.xlu0 %522 }
 0x113   :  { %v525_v48 = vadd.f32 %v524_v13, %v523_v28 }
 0x115   :  { %527 = vst.msk [vmem:[%s1098_s10] sm:$0x3] %vm526_vm1, %v525_v48 }
 0x116   :  { %708 = dma.done.wait [#allocation4], 256  }
 0x117   :  { %709 = vsyncadd [#allocation4], 4294967040 }
 0x118   :  { %545 = vsyncpa [#allocation3], 1 }
 0x119   :  { %546 = vsyncpa [#allocation4], 1 }
 0x11a   :  { %547 = vsyncpa [#allocation5], 1 }
 0x11b   :  { %548 = vsyncpa [#allocation8], 1 }
 0x11c   :  { %549 = vsyncpa [#allocation6], 1 }
 0x11d   :  { %550 = vsyncpa [#allocation11], 1 }

</bundles_post_ra>
